<compile_context>
chip_gen: v6e
topology: v6e:2x2x1
jax: 0.10.0
libtpu: 0.0.40
codegen_flags: <defaults>
</compile_context>

<pallas_src>
import jax
import jax.numpy as jnp
from jax.experimental import pallas as pl
from jax.experimental.pallas import tpu as pltpu

LANE = 128


def _round_up(x, m):
    return (x + m - 1) // m * m


def mlp_kernel(x_ref, w1_ref, b1_ref, w2_ref, b2_ref,
               w3_ref, b3_ref, w4_ref, b4_ref, o_ref):
    # hidden1 + relu (bf16 operands, f32 accumulate, bias+relu in f32)
    h = jnp.dot(x_ref[...], w1_ref[...], preferred_element_type=jnp.float32)
    h = jnp.maximum(h + b1_ref[...], 0.0).astype(jnp.bfloat16)
    # hidden2 + relu
    h = jnp.dot(h, w2_ref[...], preferred_element_type=jnp.float32)
    h = jnp.maximum(h + b2_ref[...], 0.0).astype(jnp.bfloat16)
    # hidden3 + relu
    h = jnp.dot(h, w3_ref[...], preferred_element_type=jnp.float32)
    h = jnp.maximum(h + b3_ref[...], 0.0).astype(jnp.bfloat16)
    # out (no activation)
    h = jnp.dot(h, w4_ref[...], preferred_element_type=jnp.float32)
    o_ref[...] = (h + b4_ref[...]).astype(o_ref.dtype)


def pad_params(params):
    """Zero-pad every layer's output width to a multiple of 128 lanes (and each
    subsequent layer's input to match).  Weights cast to bf16 for the MXU;
    biases stay f32 (added to the f32 accumulator)."""
    padded = []
    for i, (w, b) in enumerate(params):
        fi, fo = w.shape
        fi_p = fi if i == 0 else _round_up(fi, LANE)
        fo_p = _round_up(fo, LANE)
        wp = jnp.zeros((fi_p, fo_p), jnp.float32).at[:fi, :fo].set(w)
        bp = jnp.zeros((1, fo_p), jnp.float32).at[:, :fo].set(b)
        padded.append((wp.astype(jnp.bfloat16), bp))
    return padded


def mlp_forward(x, params, *, tile_b=256):
    """x: (batch, n_features) f32; params: unpadded f32 [(w, (1, fo) b)] * 4."""
    batch, n_features = x.shape
    n_output = params[-1][0].shape[1]

    (w1, b1), (w2, b2), (w3, b3), (w4, b4) = pad_params(params)
    out_p = w4.shape[1]

    # Batch tile: multiple of 8 sublanes; shrink for tiny batches, pad batch up
    # to a whole number of tiles so every grid step sees a full block.
    tile_b = min(tile_b, _round_up(batch, 8))
    batch_p = _round_up(batch, tile_b)

    x_p = jnp.zeros((batch_p, n_features), jnp.float32).at[:batch].set(x)
    x_p = x_p.astype(jnp.bfloat16)

    grid = (batch_p // tile_b,)
    row_spec = lambda f: pl.BlockSpec((tile_b, f), lambda i: (i, 0))
    full_spec = lambda a: pl.BlockSpec(a.shape, lambda i: (0, 0))

    out = pl.pallas_call(
        mlp_kernel,
        out_shape=jax.ShapeDtypeStruct((batch_p, out_p), jnp.float32),
        grid=grid,
        in_specs=[row_spec(n_features),
                  full_spec(w1), full_spec(b1),
                  full_spec(w2), full_spec(b2),
                  full_spec(w3), full_spec(b3),
                  full_spec(w4), full_spec(b4)],
        out_specs=row_spec(out_p),
        compiler_params=pltpu.CompilerParams(
            dimension_semantics=("parallel",)),
    )(x_p, w1, b1, w2, b2, w3, b3, w4, b4)

    return out[:batch, :n_output]


def init_params(key, n_features, n_output):
    """Deterministic PyTorch-Linear-style init; weights stored (in, out)."""
    dims = [(n_features, 100), (100, 50), (50, 20), (20, n_output)]
    params = []
    for i, (fan_in, fan_out) in enumerate(dims):
        kw, kb = jax.random.split(jax.random.fold_in(key, i))
        bound = 1.0 / float(fan_in) ** 0.5
        w = jax.random.uniform(kw, (fan_in, fan_out), jnp.float32, -bound, bound)
        b = jax.random.uniform(kb, (1, fan_out), jnp.float32, -bound, bound)
        params.append((w, b))
    return params


def reference_forward_f32(x, params):
    """Pure f32 reference (matches the PyTorch module's math)."""
    h = x
    for i, (w, b) in enumerate(params):
        h = h @ w + b
        if i < 3:
            h = jnp.maximum(h, 0.0)
    return h


def reference_forward_bf16(x, params):
    """Reference that mirrors the kernel's numerics (bf16 operands, f32 acc,
    bf16 intermediates) so the comparison tolerance can be tight."""
    h = x.astype(jnp.bfloat16)
    for i, (w, b) in enumerate(params):
        h = jnp.dot(h, w.astype(jnp.bfloat16),
                    preferred_element_type=jnp.float32) + b
        if i < 3:
            h = jnp.maximum(h, 0.0).astype(jnp.bfloat16)
    return h.astype(jnp.float32)


if __name__ == "__main__":
    key = jax.random.PRNGKey(0)
    n_features, n_output, batch = 32, 4, 8

    kx, kp = jax.random.split(key)
    x = jax.random.normal(kx, (batch, n_features), jnp.float32)
    params = init_params(kp, n_features, n_output)

    out = jax.block_until_ready(mlp_forward(x, params))
    assert out.shape == (batch, n_output)

    # Tight check against a reference that uses the same bf16/f32 mixed
    # precision as the kernel...
    ref_bf16 = reference_forward_bf16(x, params)
    assert jnp.allclose(out, ref_bf16, atol=5e-3, rtol=5e-3), \
        "mismatch vs bf16-emulating reference"
    # ...and a looser sanity check against the pure-f32 PyTorch-style math.
    ref_f32 = reference_forward_f32(x, params)
    assert jnp.allclose(out, ref_f32, atol=5e-2, rtol=5e-2), \
        "mismatch vs f32 reference"

    print("KERNEL_OK")
</pallas_src>

<mosaic_0001>
module attributes {stable_mosaic.version = 11 : i64} {
  func.func @mlp_kernel(%arg0: i32, %arg1: memref<8x32xbf16, #tpu.memory_space<vmem>>, %arg2: memref<32x128xbf16, #tpu.memory_space<vmem>>, %arg3: memref<1x128xf32, #tpu.memory_space<vmem>>, %arg4: memref<128x128xbf16, #tpu.memory_space<vmem>>, %arg5: memref<1x128xf32, #tpu.memory_space<vmem>>, %arg6: memref<128x128xbf16, #tpu.memory_space<vmem>>, %arg7: memref<1x128xf32, #tpu.memory_space<vmem>>, %arg8: memref<128x128xbf16, #tpu.memory_space<vmem>>, %arg9: memref<1x128xf32, #tpu.memory_space<vmem>>, %arg10: memref<8x128xf32, #tpu.memory_space<vmem>>) attributes {dimension_semantics = [#tpu.dimension_semantics<parallel>], iteration_bounds = array<i64: 1>, scalar_prefetch = 0 : i64, scratch_operands = 0 : i64, tpu.core_type = #tpu.core_type<tc>, window_params = [{transform_indices = @transform_0, window_bounds = array<i64: 8, 32>}, {pipeline_mode = #tpu.pipeline_mode<synchronous>, transform_indices = @transform_1, window_bounds = array<i64: 32, 128>}, {pipeline_mode = #tpu.pipeline_mode<synchronous>, transform_indices = @transform_2, window_bounds = array<i64: 1, 128>}, {pipeline_mode = #tpu.pipeline_mode<synchronous>, transform_indices = @transform_3, window_bounds = array<i64: 128, 128>}, {pipeline_mode = #tpu.pipeline_mode<synchronous>, transform_indices = @transform_4, window_bounds = array<i64: 1, 128>}, {pipeline_mode = #tpu.pipeline_mode<synchronous>, transform_indices = @transform_5, window_bounds = array<i64: 128, 128>}, {pipeline_mode = #tpu.pipeline_mode<synchronous>, transform_indices = @transform_6, window_bounds = array<i64: 1, 128>}, {pipeline_mode = #tpu.pipeline_mode<synchronous>, transform_indices = @transform_7, window_bounds = array<i64: 128, 128>}, {pipeline_mode = #tpu.pipeline_mode<synchronous>, transform_indices = @transform_8, window_bounds = array<i64: 1, 128>}, {transform_indices = @transform_9, window_bounds = array<i64: 8, 128>}]} {
    %c0 = arith.constant 0 : index
    %c0_0 = arith.constant 0 : index
    %0 = vector.load %arg1[%c0, %c0_0] : memref<8x32xbf16, #tpu.memory_space<vmem>>, vector<8x32xbf16>
    %c0_1 = arith.constant 0 : index
    %c0_2 = arith.constant 0 : index
    %1 = vector.load %arg2[%c0_1, %c0_2] : memref<32x128xbf16, #tpu.memory_space<vmem>>, vector<32x128xbf16>
    %cst = arith.constant dense<0.000000e+00> : vector<8x128xf32>
    %2 = tpu.matmul %0, %1, %cst {dimension_numbers = #tpu.dot_dimension_numbers<[1], [0], [0], [1], [0, 0, 1, 1], [], []>} : vector<8x32xbf16>, vector<32x128xbf16>, vector<8x128xf32> -> vector<8x128xf32>
    %c0_3 = arith.constant 0 : index
    %c0_4 = arith.constant 0 : index
    %3 = vector.load %arg3[%c0_3, %c0_4] : memref<1x128xf32, #tpu.memory_space<vmem>>, vector<1x128xf32>
    %4 = vector.broadcast %3 : vector<1x128xf32> to vector<8x128xf32>
    %5 = arith.addf %2, %4 : vector<8x128xf32>
    %cst_5 = arith.constant 0.000000e+00 : f32
    %6 = vector.broadcast %cst_5 : f32 to vector<8x128xf32>
    %7 = arith.maximumf %5, %6 : vector<8x128xf32>
    %8 = arith.truncf %7 : vector<8x128xf32> to vector<8x128xbf16>
    %c0_6 = arith.constant 0 : index
    %c0_7 = arith.constant 0 : index
    %9 = vector.load %arg4[%c0_6, %c0_7] : memref<128x128xbf16, #tpu.memory_space<vmem>>, vector<128x128xbf16>
    %cst_8 = arith.constant dense<0.000000e+00> : vector<8x128xf32>
    %10 = tpu.matmul %8, %9, %cst_8 {dimension_numbers = #tpu.dot_dimension_numbers<[1], [0], [0], [1], [0, 0, 1, 1], [], []>} : vector<8x128xbf16>, vector<128x128xbf16>, vector<8x128xf32> -> vector<8x128xf32>
    %c0_9 = arith.constant 0 : index
    %c0_10 = arith.constant 0 : index
    %11 = vector.load %arg5[%c0_9, %c0_10] : memref<1x128xf32, #tpu.memory_space<vmem>>, vector<1x128xf32>
    %12 = vector.broadcast %11 : vector<1x128xf32> to vector<8x128xf32>
    %13 = arith.addf %10, %12 : vector<8x128xf32>
    %cst_11 = arith.constant 0.000000e+00 : f32
    %14 = vector.broadcast %cst_11 : f32 to vector<8x128xf32>
    %15 = arith.maximumf %13, %14 : vector<8x128xf32>
    %16 = arith.truncf %15 : vector<8x128xf32> to vector<8x128xbf16>
    %c0_12 = arith.constant 0 : index
    %c0_13 = arith.constant 0 : index
    %17 = vector.load %arg6[%c0_12, %c0_13] : memref<128x128xbf16, #tpu.memory_space<vmem>>, vector<128x128xbf16>
    %cst_14 = arith.constant dense<0.000000e+00> : vector<8x128xf32>
    %18 = tpu.matmul %16, %17, %cst_14 {dimension_numbers = #tpu.dot_dimension_numbers<[1], [0], [0], [1], [0, 0, 1, 1], [], []>} : vector<8x128xbf16>, vector<128x128xbf16>, vector<8x128xf32> -> vector<8x128xf32>
    %c0_15 = arith.constant 0 : index
    %c0_16 = arith.constant 0 : index
    %19 = vector.load %arg7[%c0_15, %c0_16] : memref<1x128xf32, #tpu.memory_space<vmem>>, vector<1x128xf32>
    %20 = vector.broadcast %19 : vector<1x128xf32> to vector<8x128xf32>
    %21 = arith.addf %18, %20 : vector<8x128xf32>
    %cst_17 = arith.constant 0.000000e+00 : f32
    %22 = vector.broadcast %cst_17 : f32 to vector<8x128xf32>
    %23 = arith.maximumf %21, %22 : vector<8x128xf32>
    %24 = arith.truncf %23 : vector<8x128xf32> to vector<8x128xbf16>
    %c0_18 = arith.constant 0 : index
    %c0_19 = arith.constant 0 : index
    %25 = vector.load %arg8[%c0_18, %c0_19] : memref<128x128xbf16, #tpu.memory_space<vmem>>, vector<128x128xbf16>
    %cst_20 = arith.constant dense<0.000000e+00> : vector<8x128xf32>
    %26 = tpu.matmul %24, %25, %cst_20 {dimension_numbers = #tpu.dot_dimension_numbers<[1], [0], [0], [1], [0, 0, 1, 1], [], []>} : vector<8x128xbf16>, vector<128x128xbf16>, vector<8x128xf32> -> vector<8x128xf32>
    %c0_21 = arith.constant 0 : index
    %c0_22 = arith.constant 0 : index
    %27 = vector.load %arg9[%c0_21, %c0_22] : memref<1x128xf32, #tpu.memory_space<vmem>>, vector<1x128xf32>
    %28 = vector.broadcast %27 : vector<1x128xf32> to vector<8x128xf32>
    %29 = arith.addf %26, %28 : vector<8x128xf32>
    %c0_23 = arith.constant 0 : index
    %c0_24 = arith.constant 0 : index
    %30 = vector.load %arg10[%c0_23, %c0_24] : memref<8x128xf32, #tpu.memory_space<vmem>>, vector<8x128xf32>
    tpu.vector_store %arg10[%c0_23, %c0_24], %29 {strides = array<i32>} : memref<8x128xf32, #tpu.memory_space<vmem>>, vector<8x128xf32>,
    return
  }
  func.func @transform_0(%arg0: i32) -> (i32, i32) {
    %c0_i32 = arith.constant 0 : i32
    %c0_i32_0 = arith.constant 0 : i32
    return %arg0, %c0_i32 : i32, i32
  }
  func.func @transform_1(%arg0: i32) -> (i32, i32) {
    %c0_i32 = arith.constant 0 : i32
    %c0_i32_0 = arith.constant 0 : i32
    %c0_i32_1 = arith.constant 0 : i32
    return %c0_i32, %c0_i32_0 : i32, i32
  }
  func.func @transform_2(%arg0: i32) -> (i32, i32) {
    %c0_i32 = arith.constant 0 : i32
    %c0_i32_0 = arith.constant 0 : i32
    %c0_i32_1 = arith.constant 0 : i32
    return %c0_i32, %c0_i32_0 : i32, i32
  }
  func.func @transform_3(%arg0: i32) -> (i32, i32) {
    %c0_i32 = arith.constant 0 : i32
    %c0_i32_0 = arith.constant 0 : i32
    %c0_i32_1 = arith.constant 0 : i32
    return %c0_i32, %c0_i32_0 : i32, i32
  }
  func.func @transform_4(%arg0: i32) -> (i32, i32) {
    %c0_i32 = arith.constant 0 : i32
    %c0_i32_0 = arith.constant 0 : i32
    %c0_i32_1 = arith.constant 0 : i32
    return %c0_i32, %c0_i32_0 : i32, i32
  }
  func.func @transform_5(%arg0: i32) -> (i32, i32) {
    %c0_i32 = arith.constant 0 : i32
    %c0_i32_0 = arith.constant 0 : i32
    %c0_i32_1 = arith.constant 0 : i32
    return %c0_i32, %c0_i32_0 : i32, i32
  }
  func.func @transform_6(%arg0: i32) -> (i32, i32) {
    %c0_i32 = arith.constant 0 : i32
    %c0_i32_0 = arith.constant 0 : i32
    %c0_i32_1 = arith.constant 0 : i32
    return %c0_i32, %c0_i32_0 : i32, i32
  }
  func.func @transform_7(%arg0: i32) -> (i32, i32) {
    %c0_i32 = arith.constant 0 : i32
    %c0_i32_0 = arith.constant 0 : i32
    %c0_i32_1 = arith.constant 0 : i32
    return %c0_i32, %c0_i32_0 : i32, i32
  }
  func.func @transform_8(%arg0: i32) -> (i32, i32) {
    %c0_i32 = arith.constant 0 : i32
    %c0_i32_0 = arith.constant 0 : i32
    %c0_i32_1 = arith.constant 0 : i32
    return %c0_i32, %c0_i32_0 : i32, i32
  }
  func.func @transform_9(%arg0: i32) -> (i32, i32) {
    %c0_i32 = arith.constant 0 : i32
    %c0_i32_0 = arith.constant 0 : i32
    return %arg0, %c0_i32 : i32, i32
  }
}

</mosaic_0001>

<bundles_post_ra>
// kernel: tpu_custom_call.1
= control target key start
LH: loop header
LB: loop body
LE: loop exit
PB: predicated region body
PF: predicated region fallthrough
CT: control target
= control target key end

     0   :  { %14 = vsyncpa [#allocation3], 0  ;;  %s954_s0 = inlined_call_operand.hbm [shape: bf16[8,32], index: 0, kind: input, shape index: {}]   ;;  %s955_s1 = inlined_call_operand.hbm [shape: bf16[32,128], index: 1, kind: input, shape index: {}]   ;;  %s956_s2 = inlined_call_operand.vmem [shape: f32[1,128], index: 2, kind: input, shape index: {}]   ;;  %s957_s3 = inlined_call_operand.hbm [shape: bf16[128,128], index: 3, kind: input, shape index: {}]   ;;  %s958_s4 = inlined_call_operand.vmem [shape: f32[1,128], index: 4, kind: input, shape index: {}]   ;;  %s959_s5 = inlined_call_operand.hbm [shape: bf16[128,128], index: 5, kind: input, shape index: {}]   ;;  %s960_s6 = inlined_call_operand.vmem [shape: f32[1,128], index: 6, kind: input, shape index: {}]   ;;  %s961_s7 = inlined_call_operand.hbm [shape: bf16[128,128], index: 7, kind: input, shape index: {}]   ;;  %s962_s8 = inlined_call_operand.vmem [shape: f32[1,128], index: 8, kind: input, shape index: {}]   ;;  %s963_s9 = inlined_call_operand.hbm [shape: f32[8,128], index: 9, kind: output, shape index: {}]  }
   0x1   :  { %15 = vsyncpa [#allocation6], 0 }
   0x2   :  { %16 = vsyncpa [#allocation9], 0 }
   0x3   :  { %17 = vsyncpa [#allocation4], 0  ;;  %s818_s30 = smov [#allocation5]  }
   0x4   :  { %s33_s10 = sshll.u32 %s818_s30, 4  ;;  %s34_s10 = int_to_ptr.vmem [resolvable:$true] %s33_s10 }
   0x5   :  { %s698_s11 = scalar_lea.vmem %s34_s10, 256  ;;  %p703_p1 = scmp.lt.s32.totalorder %s34_s10, %s34_s10 }
   0x6   :  { %p699_p0 = scmp.ne.s32.totalorder %s34_s10, %s698_s11  ;;  %p704_p2 = scmp.lt.s32.totalorder %s698_s11, %s698_s11 }
   0x8   :  { %p705_p3 = por %p704_p2, %p703_p1 }
   0xa   :  { %p706_p4 = pnand %p705_p3, %p699_p0 }
   0xc   :  { %709 = shalt.err (!%p706_p4)
}
   0xd   :  { %s819_s12 = smov 64   ;;  %s820_s13 = smov 4  }
   0xe   :  { %39 = dma.hbm_to_vmem [thread:$0]  %s955_s1, 256, %s34_s10, [#allocation6], %s819_s12, %s819_s12, %s820_s13  }
   0xf   :  { %s821_s16 = smov [#allocation8]   ;;  %s822_s18 = smov [#allocation2]  }
  0x10   :  { %s61_s17 = sshll.u32 %s821_s16, 4  ;;  %s24_s19 = sshll.u32 %s822_s18, 4  ;;  %s62_s17 = int_to_ptr.vmem [resolvable:$true] %s61_s17  ;;  %s25_s19 = int_to_ptr.vmem [resolvable:$true] %s24_s19 }
  0x11   :  { %s718_s20 = scalar_lea.vmem %s62_s17, 1024  ;;  %p723_p6 = scmp.lt.s32.totalorder %s62_s17, %s62_s17 }
  0x12   :  { %p719_p5 = scmp.ne.s32.totalorder %s62_s17, %s718_s20  ;;  %p724_p7 = scmp.lt.s32.totalorder %s718_s20, %s718_s20 }
  0x14   :  { %p725_p8 = por %p724_p7, %p723_p6 }
  0x16   :  { %p726_p9 = pnand %p725_p8, %p719_p5 }
  0x18   :  { %729 = shalt.err (!%p726_p9)
}
  0x19   :  { %67 = dma.hbm_to_vmem [thread:$0]  %s959_s5, 1024, %s62_s17, [#allocation9], %s819_s12, %s819_s12, %s820_s13  }
  0x1a   :  { %s738_s1 = scalar_lea.vmem %s25_s19, 64  ;;  %p743_p11 = scmp.lt.s32.totalorder %s25_s19, %s25_s19 }
  0x1b   :  { %p739_p10 = scmp.ne.s32.totalorder %s25_s19, %s738_s1  ;;  %p744_p12 = scmp.lt.s32.totalorder %s738_s1, %s738_s1 }
  0x1d   :  { %p745_p13 = por %p744_p12, %p743_p11 }
  0x1f   :  { %p746_p0 = pnand %p745_p13, %p739_p10 }
  0x21   :  { %749 = shalt.err (!%p746_p0)
}
  0x22   :  { %27 = dma.hbm_to_vmem [thread:$0]  %s954_s0, 64, %s25_s19, [#allocation3]  }
  0x23   :  { %s823_s25 = smov [#allocation7]   ;;  %s824_s27 = smov [#allocation10]  }
  0x24   :  { %s47_s26 = sshll.u32 %s823_s25, 4  ;;  %s75_s28 = sshll.u32 %s824_s27, 4  ;;  %s48_s26 = int_to_ptr.vmem [resolvable:$true] %s47_s26  ;;  %s76_s28 = int_to_ptr.vmem [resolvable:$true] %s75_s28 }
  0x25   :  { %s758_s29 = scalar_lea.vmem %s48_s26, 1024  ;;  %p763_p2 = scmp.lt.s32.totalorder %s48_s26, %s48_s26 }
  0x26   :  { %p759_p1 = scmp.ne.s32.totalorder %s48_s26, %s758_s29  ;;  %p764_p3 = scmp.lt.s32.totalorder %s758_s29, %s758_s29 }
  0x28   :  { %p765_p4 = por %p764_p3, %p763_p2 }
  0x2a   :  { %p766_p5 = pnand %p765_p4, %p759_p1 }
  0x2c   :  { %769 = shalt.err (!%p766_p5)
}
  0x2d   :  { %53 = dma.hbm_to_vmem [thread:$0]  %s957_s3, 1024, %s48_s26, [#allocation6], %s819_s12, %s819_s12, %s820_s13  }
  0x2e   :  { %s778_s0 = scalar_lea.vmem %s76_s28, 1024  ;;  %p783_p7 = scmp.lt.s32.totalorder %s76_s28, %s76_s28 }
  0x2f   :  { %p779_p6 = scmp.ne.s32.totalorder %s76_s28, %s778_s0  ;;  %p784_p8 = scmp.lt.s32.totalorder %s778_s0, %s778_s0 }
  0x31   :  { %p785_p9 = por %p784_p8, %p783_p7 }
  0x33   :  { %p786_p10 = pnand %p785_p9, %p779_p6 }
  0x35   :  { %789 = shalt.err (!%p786_p10)
}
  0x36   :  { %81 = dma.hbm_to_vmem [thread:$0]  %s961_s7, 1024, %s76_s28, [#allocation9], %s819_s12, %s819_s12, %s820_s13  }
  0x37   :  { %810 = dma.done.wait [#allocation3], 64  }
  0x38   :  { %811 = vsyncadd [#allocation3], 4294967232 }
  0x39   :  { %812 = dma.done.wait [#allocation6], 1280  }
  0x3a   :  { %813 = vsyncadd [#allocation6], 4294966016 }
  0x3b   :  { %814 = dma.done.wait [#allocation9], 2048  }
  0x3c   :  { %815 = vsyncadd [#allocation9], 4294965248  ;;  %v825_v0 = vmov 0.0   ;;  %vm826_vm0 = vmmov 0   ;;  %v664_v1 = vld [vmem:[#allocation5 + $0x8] sm:$0xff]   ;;  %v665_v2 = vld [vmem:[#allocation5] sm:$0xff]  }
  0x3d   :  { %586 = vmatprep.subr.bf16.mxu0 %v825_v0  ;;  %590 = vmatprep.mubr.msk.bf16.mxu0 %vm826_vm0, %v825_v0  ;;  %v666_v3 = vld [vmem:[#allocation7 + $0x38] sm:$0xff]   ;;  %vm124_vm1 = vcmask 261120   ;;  %v667_v4 = vld [vmem:[#allocation7 + $0x30] sm:$0xff]   ;;  %v100_v5 = vld [vmem:[#allocation2] sm:$0xf]  ;;  %s827_s16 = smov [#allocation11]  }
  0x3e   :  { %594 = vmatprep.subr.bf16.mxu1 %v825_v0  ;;  %610 = vmatprep.mubr.msk.bf16.mxu1 %vm826_vm0, %v825_v0  ;;  %v668_v6 = vld [vmem:[#allocation7 + $0x28] sm:$0xff]   ;;  %v669_v7 = vld [vmem:[#allocation7 + $0x20] sm:$0xff]   ;;  %v670_v8 = vld [vmem:[#allocation7 + $0x18] sm:$0xff]   ;;  %s514_s17 = sshll.u32 %s827_s16, 4  ;;  %s515_s17 = int_to_ptr.vmem [resolvable:$true] %s514_s17 }
  0x3f   :  { %587 = vmatpush3.bf16.msra.mxu0 %v664_v1  ;;  %595 = vmatpush3.bf16.msra.mxu1 %v666_v3  ;;  %v671_v9 = vld [vmem:[#allocation7 + $0x10] sm:$0xff]   ;;  %v672_v10 = vld [vmem:[#allocation7 + $0x8] sm:$0xff]   ;;  %v673_v11 = vld [vmem:[#allocation7] sm:$0xff]   ;;  %p795_p12 = scmp.lt.s32.totalorder %s515_s17, %s515_s17 }
  0x40   :  { %588 = vmatprep.subr.bf16.mxu0 %v825_v0  ;;  %596 = vmatprep.subr.bf16.mxu1 %v825_v0  ;;  %v674_v12 = vld [vmem:[#allocation8 + $0x38] sm:$0xff]   ;;  %v675_v13 = vld [vmem:[#allocation8 + $0x30] sm:$0xff]   ;;  %v676_v14 = vld [vmem:[#allocation8 + $0x28] sm:$0xff]  }
  0x41   :  { %v677_v15 = vld [vmem:[#allocation8 + $0x20] sm:$0xff]   ;;  %v678_v16 = vld [vmem:[#allocation8 + $0x18] sm:$0xff]   ;;  %v679_v17 = vld [vmem:[#allocation8 + $0x10] sm:$0xff]  }
  0x42   :  { %v525_v18 = vld [vmem:[%s956_s2] ss:$0 sm:$0xff]  ;;  %v681_v27 = vld [vmem:[#allocation8] sm:$0xff]   ;;  %v682_v28 = vld [vmem:[#allocation10 + $0x38] sm:$0xff]  }
  0x43   :  { %589 = vmatpush3.bf16.msra.mxu0 %v665_v2  ;;  %597 = vmatpush3.bf16.msra.mxu1 %v667_v4  ;;  %v680_v26 = vld [vmem:[#allocation8 + $0x8] sm:$0xff]   ;;  %v683_v29 = vld [vmem:[#allocation10 + $0x30] sm:$0xff]   ;;  %v685_v31 = vld [vmem:[#allocation10 + $0x20] sm:$0xff]  }
  0x44   :  { %614 = vmatprep.subr.bf16.mxu0 %v825_v0  ;;  %598 = vmatprep.subr.bf16.mxu1 %v825_v0  ;;  %v684_v30 = vld [vmem:[#allocation10 + $0x28] sm:$0xff]   ;;  %v686_v32 = vld [vmem:[#allocation10 + $0x18] sm:$0xff]   ;;  %v687_v33 = vld [vmem:[#allocation10 + $0x10] sm:$0xff]  }
  0x45   :  { %v529_v34 = vld [vmem:[%s958_s4] ss:$0 sm:$0xff]  ;;  %v689_v43 = vld [vmem:[#allocation10] sm:$0xff]  }
  0x46   :  { %591 = vmatmul.mubr.msk.bf16.vlgmr.msra.gmra.mxu0 %vm124_vm1, %v100_v5  ;;  %v688_v42 = vld [vmem:[#allocation10 + $0x8] sm:$0xff]  }
  0x47   :  { %630 = vmatprep.mubr.msk.bf16.mxu0 %vm826_vm0, %v825_v0  ;;  %599 = vmatpush3.bf16.msra.mxu1 %v668_v6  ;;  %v538_v44 = vld [vmem:[%s960_s6] ss:$0 sm:$0xff]  ;;  %s790_s6 = scalar_lea.vmem %s515_s17, 128 }
  0x48   :  { %600 = vmatprep.subr.bf16.mxu1 %v825_v0  ;;  %615 = vmatpush3.bf16.msra.mxu0 %v674_v12  ;;  %v547_v52 = vld [vmem:[%s962_s8] ss:$0 sm:$0xff]  ;;  %p791_p11 = scmp.ne.s32.totalorder %s515_s17, %s790_s6  ;;  %p796_p13 = scmp.lt.s32.totalorder %s790_s6, %s790_s6 }
  0x49   :  { %616 = vmatprep.subr.bf16.mxu0 %v825_v0 }
  0x4a   :  { %p797_p0 = por %p796_p13, %p795_p12 }
  0x4b   :  { %601 = vmatpush3.bf16.msra.mxu1 %v669_v7 }
  0x4c   :  { %602 = vmatprep.subr.bf16.mxu1 %v825_v0  ;;  %617 = vmatpush3.bf16.msra.mxu0 %v675_v13  ;;  %p798_p1 = pnand %p797_p0, %p791_p11 }
  0x4d   :  { %618 = vmatprep.subr.bf16.mxu0 %v825_v0 }
  0x4f   :  { %603 = vmatpush3.bf16.msra.mxu1 %v670_v8 }
  0x50   :  { %604 = vmatprep.subr.bf16.mxu1 %v825_v0  ;;  %619 = vmatpush3.bf16.msra.mxu0 %v676_v14 }
  0x51   :  { %620 = vmatprep.subr.bf16.mxu0 %v825_v0 }
  0x53   :  { %605 = vmatpush3.bf16.msra.mxu1 %v671_v9 }
  0x54   :  { %606 = vmatprep.subr.bf16.mxu1 %v825_v0  ;;  %621 = vmatpush3.bf16.msra.mxu0 %v677_v15 }
  0x55   :  { %622 = vmatprep.subr.bf16.mxu0 %v825_v0 }
  0x57   :  { %607 = vmatpush3.bf16.msra.mxu1 %v672_v10 }
  0x58   :  { %608 = vmatprep.subr.bf16.mxu1 %v825_v0  ;;  %623 = vmatpush3.bf16.msra.mxu0 %v678_v16 }
  0x59   :  { %624 = vmatprep.subr.bf16.mxu0 %v825_v0 }
  0x5b   :  { %609 = vmatpush3.bf16.msra.mxu1 %v673_v11 }
  0x5c   :  { %634 = vmatprep.subr.bf16.mxu1 %v825_v0  ;;  %625 = vmatpush3.bf16.msra.mxu0 %v679_v17 }
  0x5d   :  { %626 = vmatprep.subr.bf16.mxu0 %v825_v0 }
  0x60   :  { %627 = vmatpush3.bf16.msra.mxu0 %v680_v26 }
  0x61   :  { %628 = vmatprep.subr.bf16.mxu0 %v825_v0 }
  0x64   :  { %629 = vmatpush3.bf16.msra.mxu0 %v681_v27 }
 0x106   :  { %v162_v19 = vpop.f32.mrf.mxu0 }
 0x107   :  { %v163_v20 = vadd.f32 %v525_v18, %v162_v19 }
 0x108   :  { %v592_v21 = vpop.f32.mrf.mxu0 }
 0x109   :  { %v168_v22 = vmax.f32 %v163_v20, 0.0 }
 0x10a   :  { %v165_v23 = vpop.f32.mrf.mxu0 }
 0x10b   :  { %v169_v24 = vpack.c.bf16 %v168_v22, %v168_v22 }
 0x10c   :  { %v593_v25 = vpop.f32.mrf.mxu0 }
 0x10d   :  { %611 = vmatmul.mubr.bf16.vlgmr.msra.gmra.mxu1 %v169_v24 }
 0x10e   :  { %650 = vmatprep.mubr.msk.bf16.mxu1 %vm826_vm0, %v825_v0  ;;  %635 = vmatpush3.bf16.msra.mxu1 %v682_v28 }
 0x10f   :  { %636 = vmatprep.subr.bf16.mxu1 %v825_v0 }
 0x112   :  { %637 = vmatpush3.bf16.msra.mxu1 %v683_v29 }
 0x113   :  { %638 = vmatprep.subr.bf16.mxu1 %v825_v0 }
 0x116   :  { %639 = vmatpush3.bf16.msra.mxu1 %v684_v30 }
 0x117   :  { %640 = vmatprep.subr.bf16.mxu1 %v825_v0 }
 0x11a   :  { %641 = vmatpush3.bf16.msra.mxu1 %v685_v31 }
 0x11b   :  { %642 = vmatprep.subr.bf16.mxu1 %v825_v0 }
 0x11e   :  { %643 = vmatpush3.bf16.msra.mxu1 %v686_v32 }
 0x11f   :  { %644 = vmatprep.subr.bf16.mxu1 %v825_v0 }
 0x122   :  { %645 = vmatpush3.bf16.msra.mxu1 %v687_v33 }
 0x123   :  { %646 = vmatprep.subr.bf16.mxu1 %v825_v0 }
 0x126   :  { %647 = vmatpush3.bf16.msra.mxu1 %v688_v42 }
 0x127   :  { %648 = vmatprep.subr.bf16.mxu1 %v825_v0 }
 0x12a   :  { %649 = vmatpush3.bf16.msra.mxu1 %v689_v43 }
 0x1cd   :  { %v275_v35 = vpop.f32.mrf.mxu1 }
 0x1ce   :  { %v276_v36 = vadd.f32 %v529_v34, %v275_v35 }
 0x1cf   :  { %v612_v37 = vpop.f32.mrf.mxu1 }
 0x1d0   :  { %v281_v38 = vmax.f32 %v276_v36, 0.0 }
 0x1d1   :  { %v278_v39 = vpop.f32.mrf.mxu1 }
 0x1d2   :  { %v282_v40 = vpack.c.bf16 %v281_v38, %v281_v38 }
 0x1d3   :  { %v613_v41 = vpop.f32.mrf.mxu1 }
 0x1d4   :  { %631 = vmatmul.mubr.bf16.vlgmr.msra.gmra.mxu0 %v282_v40 }
 0x294   :  { %v388_v45 = vpop.f32.mrf.mxu0 }
 0x295   :  { %v389_v46 = vadd.f32 %v538_v44, %v388_v45 }
 0x296   :  { %v632_v47 = vpop.f32.mrf.mxu0 }
 0x297   :  { %v394_v48 = vmax.f32 %v389_v46, 0.0 }
 0x298   :  { %v391_v49 = vpop.f32.mrf.mxu0 }
 0x299   :  { %v395_v50 = vpack.c.bf16 %v394_v48, %v394_v48 }
 0x29a   :  { %v633_v51 = vpop.f32.mrf.mxu0 }
 0x29b   :  { %651 = vmatmul.mubr.bf16.vlgmr.msra.gmra.mxu1 %v395_v50 }
 0x35b   :  { %v501_v53 = vpop.f32.mrf.mxu1 }
 0x35c   :  { %v502_v54 = vadd.f32 %v547_v52, %v501_v53 }
 0x35d   :  { %v652_v55 = vpop.f32.mrf.mxu1 }
 0x35e   :  { %507 = vst [vmem:[#allocation11] sm:$0xff] %v502_v54 }
 0x35f   :  { %v504_v56 = vpop.f32.mrf.mxu1 }
 0x360   :  { %801 = shalt.err (!%p798_p1)
}
 0x361   :  { %517 = dma.vmem_to_hbm [thread:$0]  %s515_s17, 128, %s963_s9, [#allocation4]   ;;  %v653_v57 = vpop.f32.mrf.mxu1 }
 0x362   :  { %816 = dma.done.wait [#allocation4], 128  }
 0x363   :  { %817 = vsyncadd [#allocation4], 4294967168 }
 0x364   :  { %521 = vsyncpa [#allocation3], 1 }
 0x365   :  { %522 = vsyncpa [#allocation6], 1 }
 0x366   :  { %523 = vsyncpa [#allocation9], 1 }
 0x367   :  { %524 = vsyncpa [#allocation4], 1 }

</bundles_post_ra>
